<compile_context>
chip_gen: v6e
topology: v6e:2x2x1
jax: 0.10.0
libtpu: 0.0.40
codegen_flags: <defaults>
</compile_context>

<pallas_src>
import numpy as np
import jax
import jax.numpy as jnp
from jax.experimental import pallas as pl
from jax.experimental.pallas import tpu as pltpu

_LANE = 128        # vreg lane width  -> feature dims padded to multiples of this
_SUBLANE = 8       # vreg sublane width -> batch dim padded to multiples of this
_VMEM_LIMIT = 48 * 1024 * 1024   # above the 32 MiB default, below v7x's 64 MiB physical


def _round_up(x, m):
    return (x + m - 1) // m * m


def _round_bf16_np(x):
    """Pure-numpy round-to-nearest-even f32 -> bf16 -> f32 (mirrors the TPU casts)."""
    x = np.ascontiguousarray(x, dtype=np.float32)
    bits = x.view(np.uint32)
    lsb = (bits >> np.uint32(16)) & np.uint32(1)
    out = (bits + np.uint32(0x7FFF) + lsb) & np.uint32(0xFFFF0000)
    return out.view(np.float32).reshape(x.shape)


# ----------------------------- Pallas kernels ------------------------------ #

def _matmul_bias_kernel(x_ref, w_ref, b_ref, o_ref):
    """One row-block of  o = x @ w + b  (bf16 operands, f32 accumulation/output)."""
    o_ref[...] = (jnp.dot(x_ref[...].astype(jnp.bfloat16), w_ref[...],
                          preferred_element_type=jnp.float32) + b_ref[...])


def _sigmoid(x):
    # sigmoid(x) = 0.5 * tanh(0.5 x) + 0.5 : one EUP tanh instead of exp + divide.
    return 0.5 * jnp.tanh(0.5 * x) + 0.5


def _bilstm_rec_kernel(len_ref, gf_ref, gb_ref, whh_f_ref, whh_b_ref,
                       of_ref, ob_ref, hf_sc, cf_sc, hb_sc, cb_sc):
    """One time-chunk of the fused bidirectional LSTM recurrence.

    Grid axis 0 = time chunks (sequential, "arbitrary").
      len_ref:   (B, 1)   int32  per-sequence lengths (padded batch rows = 0)
      gf_ref:    (T_BLK, B, 4H)  f32  forward  input-gate preactivations (natural order)
      gb_ref:    (T_BLK, B, 4H)  f32  backward input-gate preactivations (chunk index
                 reversed by the BlockSpec; in-chunk order reversed here)
      whh_*_ref: (H, 4H)  bf16   recurrent weights (gate order i, f, g, o)
      of_ref:    (T_BLK, B, H)   f32  forward hidden states
      ob_ref:    (T_BLK, B, H)   f32  backward hidden states (written at reversed local
                 index; the reversed output index_map puts the chunk back in natural order)
      *_sc:      (B, H)   f32    recurrent state, persists across chunks
    """
    c = pl.program_id(0)
    n_chunks = pl.num_programs(0)
    T_BLK = gf_ref.shape[0]
    H = hf_sc.shape[-1]

    @pl.when(c == 0)
    def _():
        hf_sc[...] = jnp.zeros_like(hf_sc)
        cf_sc[...] = jnp.zeros_like(cf_sc)
        hb_sc[...] = jnp.zeros_like(hb_sc)
        cb_sc[...] = jnp.zeros_like(cb_sc)

    lens = len_ref[...]                       # (B, 1) int32
    whh_f = whh_f_ref[...]
    whh_b = whh_b_ref[...]

    def lstm_step(h_prev, c_prev, gates_in, whh, valid):
        # Only the unavoidable recurrent matmul stays in the sequential loop.
        gates = gates_in + jnp.dot(h_prev.astype(jnp.bfloat16), whh,
                                   preferred_element_type=jnp.float32)
        i_g = _sigmoid(gates[:, 0 * H:1 * H])
        f_g = _sigmoid(gates[:, 1 * H:2 * H])
        g_g = jnp.tanh(gates[:, 2 * H:3 * H])
        o_g = _sigmoid(gates[:, 3 * H:4 * H])
        c_new = f_g * c_prev + i_g * g_g
        h_new = o_g * jnp.tanh(c_new)
        # packed-sequence semantics: freeze state / zero output on invalid steps.
        return (jnp.where(valid, h_new, h_prev),
                jnp.where(valid, c_new, c_prev),
                jnp.where(valid, h_new, 0.0))

    @pl.loop(0, T_BLK, unroll=True)
    def _(tt):
        # ---- forward direction: global time t = c*T_BLK + tt ----
        t_f = c * T_BLK + tt
        hf, cf, of = lstm_step(hf_sc[...], cf_sc[...], gf_ref[tt], whh_f, lens > t_f)
        hf_sc[...] = hf
        cf_sc[...] = cf
        of_ref[tt] = of

        # ---- backward direction: global time t = T_pad - 1 - (c*T_BLK + tt) ----
        loc = T_BLK - 1 - tt
        t_b = n_chunks * T_BLK - 1 - (c * T_BLK + tt)
        hb, cb, ob = lstm_step(hb_sc[...], cb_sc[...], gb_ref[loc], whh_b, lens > t_b)
        hb_sc[...] = hb
        cb_sc[...] = cb
        ob_ref[loc] = ob


# ------------------------------ wrappers ----------------------------------- #

def _tiled_matmul_bias(x, w, b, row_blk=256):
    """Row-tiled GEMM + bias:  x:(R,K) f32/bf16, w:(K,N) bf16, b:(1,N) f32 -> (R,N) f32."""
    R, K = x.shape
    N = w.shape[1]
    rb = row_blk if R >= row_blk else _round_up(R, _SUBLANE)
    R_pad = _round_up(R, rb)
    if R_pad != R:
        x = jnp.pad(x, ((0, R_pad - R), (0, 0)))
    # TODO(synk): K (reduction) is kept resident; for very large E/H add a K grid axis
    # with an f32 accumulator scratch.
    out = pl.pallas_call(
        _matmul_bias_kernel,
        out_shape=jax.ShapeDtypeStruct((R_pad, N), jnp.float32),
        grid_spec=pltpu.PrefetchScalarGridSpec(
            num_scalar_prefetch=0,
            grid=(R_pad // rb,),
            in_specs=[
                pl.BlockSpec((rb, K), lambda i: (i, 0)),
                pl.BlockSpec((K, N), lambda i: (0, 0)),    # loop-invariant weights
                pl.BlockSpec((1, N), lambda i: (0, 0)),
            ],
            out_specs=pl.BlockSpec((rb, N), lambda i: (i, 0)),
        ),
        compiler_params=pltpu.CompilerParams(
            dimension_semantics=("parallel",),
            vmem_limit_bytes=_VMEM_LIMIT),
    )(x, w, b)
    return out[:R] if R_pad != R else out


def _run_bilstm_recurrence(gates, lens_col, whh_f, whh_b, t_blk):
    """gates: (T_pad, B_pad, 8*H_pad) f32 = [fwd | bwd] input-gate preactivations."""
    T_pad, B_pad, _ = gates.shape
    H_pad = whh_f.shape[0]
    G4 = 4 * H_pad
    n_chunks = T_pad // t_blk

    return pl.pallas_call(
        _bilstm_rec_kernel,
        out_shape=(jax.ShapeDtypeStruct((T_pad, B_pad, H_pad), jnp.float32),
                   jax.ShapeDtypeStruct((T_pad, B_pad, H_pad), jnp.float32)),
        grid_spec=pltpu.PrefetchScalarGridSpec(
            num_scalar_prefetch=0,
            grid=(n_chunks,),
            in_specs=[
                pl.BlockSpec((B_pad, 1), lambda c: (0, 0)),                  # lengths
                pl.BlockSpec((t_blk, B_pad, G4), lambda c: (c, 0, 0)),       # fwd gates
                pl.BlockSpec((t_blk, B_pad, G4),
                             lambda c: (n_chunks - 1 - c, 0, 1)),            # bwd gates
                pl.BlockSpec((H_pad, G4), lambda c: (0, 0)),                 # W_hh fwd
                pl.BlockSpec((H_pad, G4), lambda c: (0, 0)),                 # W_hh bwd
            ],
            out_specs=(
                pl.BlockSpec((t_blk, B_pad, H_pad), lambda c: (c, 0, 0)),
                pl.BlockSpec((t_blk, B_pad, H_pad),
                             lambda c: (n_chunks - 1 - c, 0, 0)),
            ),
            scratch_shapes=[pltpu.VMEM((B_pad, H_pad), jnp.float32)
                            for _ in range(4)],
        ),
        compiler_params=pltpu.CompilerParams(
            dimension_semantics=("arbitrary",),     # recurrence: chunks are sequential
            vmem_limit_bytes=_VMEM_LIMIT),
    )(lens_col, gates, gates, whh_f, whh_b)


def bilstm_forward(packed, sents_tensor, lengths):
    """Equivalent of BiLSTM.forward(sents_tensor, lengths) (batch_first outputs)."""
    d = packed["dims"]
    E_pad, H_pad, O_pad, O = d["E_pad"], d["H_pad"], d["O_pad"], d["O"]

    lengths = np.asarray(lengths)
    B = int(sents_tensor.shape[0])
    T_out = int(lengths.max())               # pad_packed_sequence extent (trace-time const)

    B_pad = _round_up(B, _SUBLANE)
    t_blk = T_out if T_out <= 32 else 32     # whole sequence in one chunk at small T
    T_pad = _round_up(T_out, t_blk)

    # --- embedding lookup ---
    # TODO(synk): the token-id gather has no dense-BlockSpec Pallas equivalent; it is done
    # with jnp.take here (a manual-DMA gather kernel would be needed to fuse it).
    emb = jnp.take(packed["emb"], sents_tensor[:, :T_out], axis=0)   # (B, T_out, E_pad) bf16
    emb = jnp.pad(emb, ((0, B_pad - B), (0, T_pad - T_out), (0, 0)))
    x = jnp.transpose(emb, (1, 0, 2)).reshape(T_pad * B_pad, E_pad)  # time-major rows

    # --- hoisted input projection: one GEMM for all timesteps and both directions ---
    gates_in = _tiled_matmul_bias(x, packed["wih_cat"], packed["b_cat"])
    gates_in = gates_in.reshape(T_pad, B_pad, 8 * H_pad)

    # --- fused bidirectional recurrence ---
    lens_np = np.zeros((B_pad, 1), np.int32)
    lens_np[:B, 0] = lengths
    of, ob = _run_bilstm_recurrence(gates_in, jnp.asarray(lens_np),
                                    packed["whh_f"], packed["whh_b"], t_blk)

    # --- output projection ---
    rnn = jnp.concatenate([of, ob], axis=-1)                     # (T_pad, B_pad, 2H_pad)
    rnn = jnp.transpose(rnn, (1, 0, 2)).reshape(B_pad * T_pad, 2 * H_pad)
    scores = _tiled_matmul_bias(rnn, packed["lin_w"], packed["lin_b"])
    return scores.reshape(B_pad, T_pad, O_pad)[:B, :T_out, :O]


# ------------------------- parameter construction -------------------------- #

def init_params(key, vocab_size, emb_size, hidden_size, out_size):
    """Logical (PyTorch-layout) parameters. Weight matrices are pre-rounded to bf16
    values (stored as f32) so kernel bf16 casts are exact; biases stay f32."""
    ks = jax.random.split(key, 11)
    s_lstm = 1.0 / np.sqrt(hidden_size)
    s_lin = 1.0 / np.sqrt(2 * hidden_size)

    def u(k, shape, s):
        return np.asarray(jax.random.uniform(k, shape, jnp.float32, -s, s))

    embedding = np.asarray(jax.random.normal(ks[0], (vocab_size, emb_size), jnp.float32))
    w_ih_f = u(ks[1], (4 * hidden_size, emb_size), s_lstm)
    w_hh_f = u(ks[2], (4 * hidden_size, hidden_size), s_lstm)
    b_f = u(ks[3], (4 * hidden_size,), s_lstm) + u(ks[4], (4 * hidden_size,), s_lstm)
    w_ih_b = u(ks[5], (4 * hidden_size, emb_size), s_lstm)
    w_hh_b = u(ks[6], (4 * hidden_size, hidden_size), s_lstm)
    b_b = u(ks[7], (4 * hidden_size,), s_lstm) + u(ks[8], (4 * hidden_size,), s_lstm)
    lin_w = u(ks[9], (out_size, 2 * hidden_size), s_lin)
    lin_b = u(ks[10], (out_size,), s_lin)

    r = _round_bf16_np
    return {
        "embedding": r(embedding),
        "w_ih_f": r(w_ih_f), "w_hh_f": r(w_hh_f), "b_f": b_f.astype(np.float32),
        "w_ih_b": r(w_ih_b), "w_hh_b": r(w_hh_b), "b_b": b_b.astype(np.float32),
        "lin_w": r(lin_w), "lin_b": lin_b.astype(np.float32),
    }


def pack_params(params):
    """Pad (lane/sublane tiles), transpose and cast the logical params for the kernels."""
    H = params["w_hh_f"].shape[1]
    E = params["w_ih_f"].shape[1]
    O = params["lin_w"].shape[0]
    H_pad = _round_up(H, _LANE)
    E_pad = _round_up(E, _LANE)
    O_pad = _round_up(O, _LANE)

    def gate_pad_cols(w_t):            # (rows, 4H) -> (rows, 4*H_pad), per-gate padding
        rows = w_t.shape[0]
        out = np.zeros((rows, 4 * H_pad), np.float32)
        for k in range(4):             # PyTorch gate order: i, f, g, o
            out[:, k * H_pad:k * H_pad + H] = w_t[:, k * H:(k + 1) * H]
        return out

    def pad_rows(w, rows_pad):
        out = np.zeros((rows_pad, w.shape[1]), np.float32)
        out[:w.shape[0]] = w
        return out

    wih_f = pad_rows(gate_pad_cols(params["w_ih_f"].T), E_pad)     # (E_pad, 4H_pad)
    wih_b = pad_rows(gate_pad_cols(params["w_ih_b"].T), E_pad)
    wih_cat = np.concatenate([wih_f, wih_b], axis=1)               # (E_pad, 8H_pad)
    b_cat = np.concatenate([gate_pad_cols(params["b_f"][None, :]),
                            gate_pad_cols(params["b_b"][None, :])], axis=1)

    whh_f = pad_rows(gate_pad_cols(params["w_hh_f"].T), H_pad)     # (H_pad, 4H_pad)
    whh_b = pad_rows(gate_pad_cols(params["w_hh_b"].T), H_pad)

    lin_w_t = params["lin_w"].T                                    # (2H, O)
    lin_w = np.zeros((2 * H_pad, O_pad), np.float32)
    lin_w[:H, :O] = lin_w_t[:H]                    # forward-half rows
    lin_w[H_pad:H_pad + H, :O] = lin_w_t[H:]       # backward-half rows
    lin_b = np.zeros((1, O_pad), np.float32)
    lin_b[0, :O] = params["lin_b"]

    emb = np.zeros((params["embedding"].shape[0], E_pad), np.float32)
    emb[:, :E] = params["embedding"]

    return {
        "emb": jnp.asarray(emb, jnp.bfloat16),
        "wih_cat": jnp.asarray(wih_cat, jnp.bfloat16),
        "b_cat": jnp.asarray(b_cat, jnp.float32),
        "whh_f": jnp.asarray(whh_f, jnp.bfloat16),
        "whh_b": jnp.asarray(whh_b, jnp.bfloat16),
        "lin_w": jnp.asarray(lin_w, jnp.bfloat16),
        "lin_b": jnp.asarray(lin_b, jnp.float32),
        "dims": dict(E=E, H=H, O=O, E_pad=E_pad, H_pad=H_pad, O_pad=O_pad),
    }


# ------------------------------ pure reference ----------------------------- #

def reference_forward(params, sents, lengths):
    """Numpy reference of the PyTorch forward (mirrors the kernel's bf16 operand casts)."""
    sents = np.asarray(sents)
    lengths = np.asarray(lengths)
    T_out = int(lengths.max())
    emb = params["embedding"][sents[:, :T_out]]          # (B, T_out, E), bf16-exact values
    B = emb.shape[0]
    H = params["w_hh_f"].shape[1]

    def sigmoid(x):
        return 1.0 / (1.0 + np.exp(-x))

    def run_dir(w_ih, w_hh, b, reverse):
        wih_t, whh_t = w_ih.T, w_hh.T
        out = np.zeros((B, T_out, H), np.float32)
        for bi in range(B):
            L = int(lengths[bi])
            h = np.zeros(H, np.float32)
            c = np.zeros(H, np.float32)
            steps = range(L - 1, -1, -1) if reverse else range(L)
            for t in steps:
                h16 = _round_bf16_np(h)                  # mirror in-kernel bf16 cast of h
                g = emb[bi, t] @ wih_t + h16 @ whh_t + b
                i = sigmoid(g[:H]); f = sigmoid(g[H:2 * H])
                gg = np.tanh(g[2 * H:3 * H]); o = sigmoid(g[3 * H:4 * H])
                c = f * c + i * gg
                h = o * np.tanh(c)
                out[bi, t] = h
        return out

    hf = run_dir(params["w_ih_f"], params["w_hh_f"], params["b_f"], False)
    hb = run_dir(params["w_ih_b"], params["w_hh_b"], params["b_b"], True)
    rnn = _round_bf16_np(np.concatenate([hf, hb], axis=-1))  # mirror bf16 cast before lin
    return rnn @ params["lin_w"].T + params["lin_b"]


# ---------------------------------- main ------------------------------------ #

if __name__ == "__main__":
    vocab_size, emb_size, hidden_size, out_size = 50, 16, 32, 10
    B, T = 2, 8

    key = jax.random.PRNGKey(0)
    k_param, k_data = jax.random.split(key)

    params = init_params(k_param, vocab_size, emb_size, hidden_size, out_size)
    packed = pack_params(params)

    sents = jax.random.randint(k_data, (B, T), 0, vocab_size, dtype=jnp.int32)
    lengths = np.array([8, 5], dtype=np.int32)   # sorted descending (enforce_sorted)

    scores = bilstm_forward(packed, sents, lengths)
    scores = jax.block_until_ready(scores)

    ref = reference_forward(params, sents, lengths)
    np.testing.assert_allclose(np.asarray(scores), ref, rtol=1e-3, atol=1e-3)

    assert scores.shape == (B, int(lengths.max()), out_size)
    print("KERNEL_OK")
</pallas_src>

<mosaic_0001>
module attributes {stable_mosaic.version = 11 : i64} {
  func.func @_matmul_bias_kernel(%arg0: i32, %arg1: memref<64x128xbf16, #tpu.memory_space<vmem>>, %arg2: memref<128x1024xbf16, #tpu.memory_space<vmem>>, %arg3: memref<1x1024xf32, #tpu.memory_space<vmem>>, %arg4: memref<64x1024xf32, #tpu.memory_space<vmem>>) attributes {dimension_semantics = [#tpu.dimension_semantics<parallel>], iteration_bounds = array<i64: 1>, scalar_prefetch = 0 : i64, scratch_operands = 0 : i64, tpu.core_type = #tpu.core_type<tc>, window_params = [{transform_indices = @transform_0, window_bounds = array<i64: 64, 128>}, {pipeline_mode = #tpu.pipeline_mode<synchronous>, transform_indices = @transform_1, window_bounds = array<i64: 128, 1024>}, {pipeline_mode = #tpu.pipeline_mode<synchronous>, transform_indices = @transform_2, window_bounds = array<i64: 1, 1024>}, {transform_indices = @transform_3, window_bounds = array<i64: 64, 1024>}]} {
    %c0 = arith.constant 0 : index
    %c0_0 = arith.constant 0 : index
    %0 = vector.load %arg1[%c0, %c0_0] : memref<64x128xbf16, #tpu.memory_space<vmem>>, vector<64x128xbf16>
    %c0_1 = arith.constant 0 : index
    %c0_2 = arith.constant 0 : index
    %1 = vector.load %arg2[%c0_1, %c0_2] : memref<128x1024xbf16, #tpu.memory_space<vmem>>, vector<128x1024xbf16>
    %cst = arith.constant dense<0.000000e+00> : vector<64x1024xf32>
    %2 = tpu.matmul %0, %1, %cst {dimension_numbers = #tpu.dot_dimension_numbers<[1], [0], [0], [1], [0, 0, 1, 1], [], []>} : vector<64x128xbf16>, vector<128x1024xbf16>, vector<64x1024xf32> -> vector<64x1024xf32>
    %c0_3 = arith.constant 0 : index
    %c0_4 = arith.constant 0 : index
    %3 = vector.load %arg3[%c0_3, %c0_4] : memref<1x1024xf32, #tpu.memory_space<vmem>>, vector<1x1024xf32>
    %4 = vector.broadcast %3 : vector<1x1024xf32> to vector<64x1024xf32>
    %5 = arith.addf %2, %4 : vector<64x1024xf32>
    %c0_5 = arith.constant 0 : index
    %c0_6 = arith.constant 0 : index
    %6 = vector.load %arg4[%c0_5, %c0_6] : memref<64x1024xf32, #tpu.memory_space<vmem>>, vector<64x1024xf32>
    tpu.vector_store %arg4[%c0_5, %c0_6], %5 {strides = array<i32>} : memref<64x1024xf32, #tpu.memory_space<vmem>>, vector<64x1024xf32>,
    return
  }
  func.func @transform_0(%arg0: i32) -> (i32, i32) {
    %c0_i32 = arith.constant 0 : i32
    %c0_i32_0 = arith.constant 0 : i32
    return %arg0, %c0_i32 : i32, i32
  }
  func.func @transform_1(%arg0: i32) -> (i32, i32) {
    %c0_i32 = arith.constant 0 : i32
    %c0_i32_0 = arith.constant 0 : i32
    %c0_i32_1 = arith.constant 0 : i32
    return %c0_i32, %c0_i32_0 : i32, i32
  }
  func.func @transform_2(%arg0: i32) -> (i32, i32) {
    %c0_i32 = arith.constant 0 : i32
    %c0_i32_0 = arith.constant 0 : i32
    %c0_i32_1 = arith.constant 0 : i32
    return %c0_i32, %c0_i32_0 : i32, i32
  }
  func.func @transform_3(%arg0: i32) -> (i32, i32) {
    %c0_i32 = arith.constant 0 : i32
    %c0_i32_0 = arith.constant 0 : i32
    return %arg0, %c0_i32 : i32, i32
  }
}

</mosaic_0001>

<bundles_post_ra>
// kernel: tpu_custom_call.1
= control target key start
LH: loop header
LB: loop body
LE: loop exit
PB: predicated region body
PF: predicated region fallthrough
CT: control target
= control target key end

     0   :  { %8 = vsyncpa [#allocation3], 0  ;;  %s1228_s0 = inlined_call_operand.hbm [shape: bf16[64,128], index: 0, kind: input, shape index: {}]   ;;  %s1229_s1 = inlined_call_operand.hbm [shape: bf16[128,1024], index: 1, kind: input, shape index: {}]   ;;  %s1230_s2 = inlined_call_operand.hbm [shape: f32[1,1024], index: 2, kind: input, shape index: {}]   ;;  %s1231_s3 = inlined_call_operand.hbm [shape: f32[64,1024], index: 3, kind: output, shape index: {}]  }
   0x1   :  { %9 = vsyncpa [#allocation6], 0 }
   0x2   :  { %10 = vsyncpa [#allocation4], 0  ;;  %s1055_s12 = smov [#allocation5]  }
   0x3   :  { %s28_s13 = sshll.u32 %s1055_s12, 4  ;;  %s29_s13 = int_to_ptr.vmem [resolvable:$true] %s28_s13 }
   0x4   :  { %s977_s14 = scalar_lea.vmem %s29_s13, 8192  ;;  %p982_p1 = scmp.lt.s32.totalorder %s29_s13, %s29_s13 }
   0x5   :  { %p978_p0 = scmp.ne.s32.totalorder %s29_s13, %s977_s14  ;;  %p983_p2 = scmp.lt.s32.totalorder %s977_s14, %s977_s14 }
   0x7   :  { %p984_p3 = por %p983_p2, %p982_p1 }
   0x9   :  { %p985_p4 = pnand %p984_p3, %p978_p0 }
   0xb   :  { %988 = shalt.err (!%p985_p4)
}
   0xc   :  { %s1056_s15 = smov 512   ;;  %s1057_s16 = smov 32  }
   0xd   :  { %34 = dma.hbm_to_vmem [thread:$0]  %s1229_s1, 8192, %s29_s13, [#allocation6], %s1056_s15, %s1056_s15, %s1057_s16  }
   0xe   :  { %s1058_s19 = smov [#allocation2]  }
   0xf   :  { %s16_s20 = sshll.u32 %s1058_s19, 4  ;;  %s17_s20 = int_to_ptr.vmem [resolvable:$true] %s16_s20 }
  0x10   :  { %s997_s21 = scalar_lea.vmem %s17_s20, 512  ;;  %p1002_p6 = scmp.lt.s32.totalorder %s17_s20, %s17_s20 }
  0x11   :  { %p998_p5 = scmp.ne.s32.totalorder %s17_s20, %s997_s21  ;;  %p1003_p7 = scmp.lt.s32.totalorder %s997_s21, %s997_s21 }
  0x13   :  { %p1004_p8 = por %p1003_p7, %p1002_p6 }
  0x15   :  { %p1005_p9 = pnand %p1004_p8, %p998_p5 }
  0x17   :  { %1008 = shalt.err (!%p1005_p9)
}
  0x18   :  { %s1059_s22 = smov 64   ;;  %s1060_s23 = smov 4  }
  0x19   :  { %22 = dma.hbm_to_vmem [thread:$0]  %s1228_s0, 512, %s17_s20, [#allocation3], %s1059_s22, %s1059_s22, %s1060_s23  }
  0x1a   :  { %s1061_s26 = smov [#allocation7]  }
  0x1b   :  { %s41_s1 = sshll.u32 %s1061_s26, 4  ;;  %s42_s1 = int_to_ptr.vmem [resolvable:$true] %s41_s1 }
  0x1c   :  { %s1017_s27 = scalar_lea.vmem %s42_s1, 128  ;;  %p1022_p11 = scmp.lt.s32.totalorder %s42_s1, %s42_s1 }
  0x1d   :  { %p1018_p10 = scmp.ne.s32.totalorder %s42_s1, %s1017_s27  ;;  %p1023_p12 = scmp.lt.s32.totalorder %s1017_s27, %s1017_s27 }
  0x1f   :  { %p1024_p13 = por %p1023_p12, %p1022_p11 }
  0x21   :  { %p1025_p0 = pnand %p1024_p13, %p1018_p10 }
  0x23   :  { %1028 = shalt.err (!%p1025_p0)
}
  0x24   :  { %44 = dma.hbm_to_vmem [thread:$0]  %s1230_s2, 128, %s42_s1, [#allocation6]  }
  0x25   :  { %1049 = dma.done.wait [#allocation3], 512  }
  0x26   :  { %1050 = vsyncadd [#allocation3], 4294966784 }
  0x27   :  { %1051 = dma.done.wait [#allocation6], 8320  }
  0x28   :  { %1052 = vsyncadd [#allocation6], 4294958976  ;;  %v1062_v0 = vmov 0   ;;  %v119_v1 = vld [vmem:[#allocation5 + $0x1c0] sm:$0xff]  ;;  %v120_v3 = vld [vmem:[#allocation5 + $0x1c8] sm:$0xff]  ;;  %s1063_s0 = smov [#allocation8]  }
  0x29   :  { %545 = vmatprep.mubr.bf16.mxu0 %v1062_v0  ;;  %618 = vmatprep.mubr.bf16.mxu1 %v1062_v0  ;;  %v123_v2 = vld [vmem:[#allocation5 + $0x1e0] sm:$0xff]  ;;  %v124_v5 = vld [vmem:[#allocation5 + $0x1e8] sm:$0xff]  ;;  %v121_v63 = vld [vmem:[#allocation5 + $0x1d0] sm:$0xff]  ;;  %s874_s2 = sshll.u32 %s1063_s0, 4  ;;  %s875_s2 = int_to_ptr.vmem [resolvable:$true] %s874_s2 }
  0x2a   :  { %v948_v4 = vcombine.high %v119_v1, %v123_v2  ;;  %v947_v6 = vcombine.low %v119_v1, %v123_v2  ;;  %v111_v7 = vld [vmem:[#allocation5 + $0x180] sm:$0xff]  ;;  %v950_v9 = vcombine.high %v120_v3, %v124_v5  ;;  %v949_v10 = vcombine.low %v120_v3, %v124_v5  ;;  %v112_v12 = vld [vmem:[#allocation5 + $0x188] sm:$0xff]  ;;  %v125_v1 = vld [vmem:[#allocation5 + $0x1f0] sm:$0xff]  ;;  %s1029_s30 = scalar_lea.vmem %s875_s2, 8192  ;;  %p1034_p2 = scmp.lt.s32.totalorder %s875_s2, %s875_s2 }
  0x2b   :  { %v115_v8 = vld [vmem:[#allocation5 + $0x1a0] sm:$0xff]  ;;  %v116_v13 = vld [vmem:[#allocation5 + $0x1a8] sm:$0xff]  ;;  %v122_v2 = vld [vmem:[#allocation5 + $0x1d8] sm:$0xff]  ;;  %p1030_p1 = scmp.ne.s32.totalorder %s875_s2, %s1029_s30  ;;  %p1035_p3 = scmp.lt.s32.totalorder %s1029_s30, %s1029_s30 }
  0x2c   :  { %v940_v11 = vcombine.high %v111_v7, %v115_v8  ;;  %v103_v14 = vld [vmem:[#allocation5 + $0x140] sm:$0xff]  ;;  %513 = vmatprep.subr.bf16.mxu0 %v948_v4  ;;  %v942_v15 = vcombine.high %v112_v12, %v116_v13  ;;  %v104_v17 = vld [vmem:[#allocation5 + $0x148] sm:$0xff]  ;;  %586 = vmatprep.subr.bf16.mxu1 %v950_v9  ;;  %v939_v19 = vcombine.low %v111_v7, %v115_v8  ;;  %v126_v3 = vld [vmem:[#allocation5 + $0x1f8] sm:$0xff] }
  0x2d   :  { %v107_v16 = vld [vmem:[#allocation5 + $0x160] sm:$0xff]  ;;  %v108_v18 = vld [vmem:[#allocation5 + $0x168] sm:$0xff]  ;;  %514 = vmatpush1.bf16.msra.mxu0 %v947_v6  ;;  %587 = vmatpush1.bf16.msra.mxu1 %v949_v10  ;;  %v941_v20 = vcombine.low %v112_v12, %v116_v13  ;;  %v952_v6 = vcombine.high %v121_v63, %v125_v1  ;;  %v954_v7 = vcombine.high %v122_v2, %v126_v3  ;;  %v113_v8 = vld [vmem:[#allocation5 + $0x190] sm:$0xff]  ;;  %p1036_p4 = por %p1035_p3, %p1034_p2 }
  0x2e   :  { %515 = vmatprep.subr.bf16.mxu0 %v940_v11  ;;  %v932_v21 = vcombine.high %v103_v14, %v107_v16  ;;  %588 = vmatprep.subr.bf16.mxu1 %v942_v15  ;;  %v934_v22 = vcombine.high %v104_v17, %v108_v18  ;;  %v95_v23 = vld [vmem:[#allocation5 + $0x100] sm:$0xff]  ;;  %v96_v25 = vld [vmem:[#allocation5 + $0x108] sm:$0xff]  ;;  %v931_v27 = vcombine.low %v103_v14, %v107_v16  ;;  %v117_v9 = vld [vmem:[#allocation5 + $0x1b0] sm:$0xff] }
  0x2f   :  { %v99_v24 = vld [vmem:[#allocation5 + $0x120] sm:$0xff]  ;;  %v100_v26 = vld [vmem:[#allocation5 + $0x128] sm:$0xff]  ;;  %v933_v28 = vcombine.low %v104_v17, %v108_v18  ;;  %v114_v11 = vld [vmem:[#allocation5 + $0x198] sm:$0xff]  ;;  %v951_v13 = vcombine.low %v121_v63, %v125_v1  ;;  %v953_v14 = vcombine.low %v122_v2, %v126_v3  ;;  %v944_v15 = vcombine.high %v113_v8, %v117_v9  ;;  %p1037_p5 = pnand %p1036_p4, %p1030_p1 }
  0x30   :  { %v924_v29 = vcombine.high %v95_v23, %v99_v24  ;;  %v926_v30 = vcombine.high %v96_v25, %v100_v26  ;;  %v87_v31 = vld [vmem:[#allocation5 + $0xc0] sm:$0xff]  ;;  %v88_v33 = vld [vmem:[#allocation5 + $0xc8] sm:$0xff]  ;;  %v923_v35 = vcombine.low %v95_v23, %v99_v24  ;;  %v925_v36 = vcombine.low %v96_v25, %v100_v26  ;;  %v118_v12 = vld [vmem:[#allocation5 + $0x1b8] sm:$0xff] }
  0x31   :  { %516 = vmatpush1.bf16.msra.mxu0 %v939_v19  ;;  %589 = vmatpush1.bf16.msra.mxu1 %v941_v20  ;;  %v91_v32 = vld [vmem:[#allocation5 + $0xe0] sm:$0xff]  ;;  %v92_v34 = vld [vmem:[#allocation5 + $0xe8] sm:$0xff]  ;;  %v946_v16 = vcombine.high %v114_v11, %v118_v12  ;;  %v105_v17 = vld [vmem:[#allocation5 + $0x150] sm:$0xff] }
  0x32   :  { %517 = vmatprep.subr.bf16.mxu0 %v932_v21  ;;  %590 = vmatprep.subr.bf16.mxu1 %v934_v22  ;;  %v916_v37 = vcombine.high %v87_v31, %v91_v32  ;;  %v79_v38 = vld [vmem:[#allocation5 + $0x80] sm:$0xff]  ;;  %v918_v39 = vcombine.high %v88_v33, %v92_v34  ;;  %v80_v41 = vld [vmem:[#allocation5 + $0x88] sm:$0xff]  ;;  %v915_v43 = vcombine.low %v87_v31, %v91_v32  ;;  %v109_v18 = vld [vmem:[#allocation5 + $0x170] sm:$0xff] }
  0x33   :  { %v83_v40 = vld [vmem:[#allocation5 + $0xa0] sm:$0xff]  ;;  %v84_v42 = vld [vmem:[#allocation5 + $0xa8] sm:$0xff]  ;;  %v917_v44 = vcombine.low %v88_v33, %v92_v34  ;;  %v106_v19 = vld [vmem:[#allocation5 + $0x158] sm:$0xff]  ;;  %v943_v21 = vcombine.low %v113_v8, %v117_v9  ;;  %v945_v22 = vcombine.low %v114_v11, %v118_v12  ;;  %v936_v23 = vcombine.high %v105_v17, %v109_v18 }
  0x34   :  { %v908_v45 = vcombine.high %v79_v38, %v83_v40  ;;  %v71_v46 = vld [vmem:[#allocation5 + $0x40] sm:$0xff]  ;;  %v910_v47 = vcombine.high %v80_v41, %v84_v42  ;;  %v72_v49 = vld [vmem:[#allocation5 + $0x48] sm:$0xff]  ;;  %v907_v51 = vcombine.low %v79_v38, %v83_v40  ;;  %v909_v52 = vcombine.low %v80_v41, %v84_v42  ;;  %v110_v20 = vld [vmem:[#allocation5 + $0x178] sm:$0xff] }
  0x35   :  { %518 = vmatpush1.bf16.msra.mxu0 %v931_v27  ;;  %591 = vmatpush1.bf16.msra.mxu1 %v933_v28  ;;  %v75_v48 = vld [vmem:[#allocation5 + $0x60] sm:$0xff]  ;;  %v76_v50 = vld [vmem:[#allocation5 + $0x68] sm:$0xff]  ;;  %v938_v24 = vcombine.high %v106_v19, %v110_v20  ;;  %v97_v25 = vld [vmem:[#allocation5 + $0x110] sm:$0xff]  ;;  %v937_v31 = vcombine.low %v106_v19, %v110_v20 }
  0x36   :  { %519 = vmatprep.subr.bf16.mxu0 %v924_v29  ;;  %592 = vmatprep.subr.bf16.mxu1 %v926_v30  ;;  %v900_v53 = vcombine.high %v71_v46, %v75_v48  ;;  %v902_v54 = vcombine.high %v72_v49, %v76_v50  ;;  %v63_v55 = vld [vmem:[#allocation5] sm:$0xff]  ;;  %v64_v57 = vld [vmem:[#allocation5 + $0x8] sm:$0xff]  ;;  %v899_v59 = vcombine.low %v71_v46, %v75_v48  ;;  %v101_v26 = vld [vmem:[#allocation5 + $0x130] sm:$0xff] }
  0x37   :  { %v67_v56 = vld [vmem:[#allocation5 + $0x20] sm:$0xff]  ;;  %v68_v58 = vld [vmem:[#allocation5 + $0x28] sm:$0xff]  ;;  %v901_v60 = vcombine.low %v72_v49, %v76_v50  ;;  %v98_v28 = vld [vmem:[#allocation5 + $0x118] sm:$0xff]  ;;  %v935_v30 = vcombine.low %v105_v17, %v109_v18  ;;  %v928_v32 = vcombine.high %v97_v25, %v101_v26  ;;  %v927_v38 = vcombine.low %v97_v25, %v101_v26 }
  0x38   :  { %v892_v61 = vcombine.high %v63_v55, %v67_v56  ;;  %v894_v62 = vcombine.high %v64_v57, %v68_v58  ;;  %v891_v4 = vcombine.low %v63_v55, %v67_v56  ;;  %v893_v5 = vcombine.low %v64_v57, %v68_v58  ;;  %v1098_v10 = vld [vmem:[#allocation2] sm:$0xff]   ;;  %v1104_v27 = vld [vmem:[#allocation2 + $0x8] sm:$0xff]   ;;  %v102_v29 = vld [vmem:[#allocation5 + $0x138] sm:$0xff] }
  0x39   :  { %520 = vmatpush1.bf16.msra.mxu0 %v923_v35  ;;  %593 = vmatpush1.bf16.msra.mxu1 %v925_v36  ;;  %v930_v33 = vcombine.high %v98_v28, %v102_v29  ;;  %v89_v34 = vld [vmem:[#allocation5 + $0xd0] sm:$0xff]  ;;  %v90_v36 = vld [vmem:[#allocation5 + $0xd8] sm:$0xff] }
  0x3a   :  { %521 = vmatprep.subr.bf16.mxu0 %v916_v37  ;;  %594 = vmatprep.subr.bf16.mxu1 %v918_v39  ;;  %v93_v35 = vld [vmem:[#allocation5 + $0xf0] sm:$0xff]  ;;  %v94_v37 = vld [vmem:[#allocation5 + $0xf8] sm:$0xff]  ;;  %v929_v39 = vcombine.low %v98_v28, %v102_v29 }
  0x3b   :  { %v920_v40 = vcombine.high %v89_v34, %v93_v35  ;;  %v922_v41 = vcombine.high %v90_v36, %v94_v37  ;;  %v81_v42 = vld [vmem:[#allocation5 + $0x90] sm:$0xff]  ;;  %v86_v46 = vld [vmem:[#allocation5 + $0xb8] sm:$0xff]  ;;  %v921_v48 = vcombine.low %v90_v36, %v94_v37 }
  0x3c   :  { %v70_v63 = vld [vmem:[#allocation5 + $0x38] sm:$0xff] }
  0x3d   :  { %522 = vmatpush1.bf16.msra.mxu0 %v915_v43  ;;  %595 = vmatpush1.bf16.msra.mxu1 %v917_v44  ;;  %v85_v43 = vld [vmem:[#allocation5 + $0xb0] sm:$0xff] }
  0x3e   :  { %523 = vmatprep.subr.bf16.mxu0 %v908_v45  ;;  %596 = vmatprep.subr.bf16.mxu1 %v910_v47  ;;  %v967_v44 = vld [vmem:[#allocation2 + $0x10] sm:$0xff]   ;;  %v82_v45 = vld [vmem:[#allocation5 + $0x98] sm:$0xff]  ;;  %v919_v47 = vcombine.low %v89_v34, %v93_v35  ;;  %v912_v49 = vcombine.high %v81_v42, %v85_v43  ;;  %v911_v55 = vcombine.low %v81_v42, %v85_v43 }
  0x3f   :  { %v914_v50 = vcombine.high %v82_v45, %v86_v46  ;;  %v913_v56 = vcombine.low %v82_v45, %v86_v46 }
  0x41   :  { %524 = vmatpush1.bf16.msra.mxu0 %v907_v51  ;;  %597 = vmatpush1.bf16.msra.mxu1 %v909_v52  ;;  %v73_v51 = vld [vmem:[#allocation5 + $0x50] sm:$0xff] }
  0x42   :  { %525 = vmatprep.subr.bf16.mxu0 %v900_v53  ;;  %598 = vmatprep.subr.bf16.mxu1 %v902_v54  ;;  %v77_v52 = vld [vmem:[#allocation5 + $0x70] sm:$0xff]  ;;  %v74_v53 = vld [vmem:[#allocation5 + $0x58] sm:$0xff] }
  0x43   :  { %v78_v54 = vld [vmem:[#allocation5 + $0x78] sm:$0xff]  ;;  %v904_v57 = vcombine.high %v73_v51, %v77_v52  ;;  %v903_v1 = vcombine.low %v73_v51, %v77_v52 }
  0x44   :  { %v906_v58 = vcombine.high %v74_v53, %v78_v54  ;;  %v905_v2 = vcombine.low %v74_v53, %v78_v54 }
  0x45   :  { %526 = vmatpush1.bf16.msra.mxu0 %v899_v59  ;;  %599 = vmatpush1.bf16.msra.mxu1 %v901_v60  ;;  %v65_v59 = vld [vmem:[#allocation5 + $0x10] sm:$0xff] }
  0x46   :  { %527 = vmatprep.subr.bf16.mxu0 %v892_v61  ;;  %600 = vmatprep.subr.bf16.mxu1 %v894_v62  ;;  %v69_v60 = vld [vmem:[#allocation5 + $0x30] sm:$0xff]  ;;  %v968_v61 = vld [vmem:[#allocation2 + $0x18] sm:$0xff]  }
  0x47   :  { %v66_v62 = vld [vmem:[#allocation5 + $0x18] sm:$0xff]  ;;  %v896_v3 = vcombine.high %v65_v59, %v69_v60 }
  0x49   :  { %528 = vmatpush1.bf16.msra.mxu0 %v891_v4  ;;  %601 = vmatpush1.bf16.msra.mxu1 %v893_v5  ;;  %v898_v4 = vcombine.high %v66_v62, %v70_v63  ;;  %v895_v5 = vcombine.low %v65_v59, %v69_v60 }
  0x4a   :  { %659 = vmatprep.subr.bf16.mxu0 %v952_v6  ;;  %732 = vmatprep.subr.bf16.mxu1 %v954_v7  ;;  %v897_v6 = vcombine.low %v66_v62, %v70_v63  ;;  %v129_v7 = vlaneseq }
  0x4c   :  { %546 = vmatmul.mubr.bf16.vlgmr.msra.gmra.mxu0 %v1098_v10  ;;  %619 = vmatmul.mubr.bf16.vlgmr.msra.gmra.mxu1 %v1098_v10  ;;  %v1124_v8 = vshrl.u32 %v129_v7, 7 }
  0x4d   :  { %660 = vmatpush1.bf16.msra.mxu0 %v951_v13  ;;  %733 = vmatpush1.bf16.msra.mxu1 %v953_v14 }
  0x4e   :  { %661 = vmatprep.subr.bf16.mxu0 %v944_v15  ;;  %734 = vmatprep.subr.bf16.mxu1 %v946_v16  ;;  %v131_v9 = vsub.s32 0, %v1124_v8  ;;  %v139_v11 = vsub.s32 2, %v1124_v8  ;;  %v135_v12 = vsub.s32 1, %v1124_v8  ;;  %v143_v13 = vsub.s32 3, %v1124_v8 }
  0x4f   :  { %555 = vmatprep.mubr.bf16.mxu0 %v1062_v0  ;;  %628 = vmatprep.mubr.bf16.mxu1 %v1062_v0 }
  0x51   :  { %662 = vmatpush1.bf16.msra.mxu0 %v943_v21  ;;  %735 = vmatpush1.bf16.msra.mxu1 %v945_v22 }
  0x52   :  { %663 = vmatprep.subr.bf16.mxu0 %v936_v23  ;;  %736 = vmatprep.subr.bf16.mxu1 %v938_v24 }
  0x54   :  { %556 = vmatmul.mubr.bf16.gmra.mxu0 %v1104_v27  ;;  %629 = vmatmul.mubr.bf16.gmra.mxu1 %v1104_v27 }
  0x55   :  { %664 = vmatpush1.bf16.msra.mxu0 %v935_v30  ;;  %737 = vmatpush1.bf16.msra.mxu1 %v937_v31 }
  0x56   :  { %665 = vmatprep.subr.bf16.mxu0 %v928_v32  ;;  %738 = vmatprep.subr.bf16.mxu1 %v930_v33 }
  0x57   :  { %565 = vmatprep.mubr.bf16.mxu0 %v1062_v0  ;;  %638 = vmatprep.mubr.bf16.mxu1 %v1062_v0 }
  0x59   :  { %666 = vmatpush1.bf16.msra.mxu0 %v927_v38  ;;  %739 = vmatpush1.bf16.msra.mxu1 %v929_v39 }
  0x5a   :  { %667 = vmatprep.subr.bf16.mxu0 %v920_v40  ;;  %740 = vmatprep.subr.bf16.mxu1 %v922_v41 }
  0x5c   :  { %566 = vmatmul.mubr.bf16.gmra.mxu0 %v967_v44  ;;  %639 = vmatmul.mubr.bf16.gmra.mxu1 %v967_v44 }
  0x5d   :  { %668 = vmatpush1.bf16.msra.mxu0 %v919_v47  ;;  %741 = vmatpush1.bf16.msra.mxu1 %v921_v48 }
  0x5e   :  { %669 = vmatprep.subr.bf16.mxu0 %v912_v49  ;;  %742 = vmatprep.subr.bf16.mxu1 %v914_v50 }
  0x5f   :  { %575 = vmatprep.mubr.bf16.mxu0 %v1062_v0  ;;  %648 = vmatprep.mubr.bf16.mxu1 %v1062_v0 }
  0x61   :  { %670 = vmatpush1.bf16.msra.mxu0 %v911_v55  ;;  %743 = vmatpush1.bf16.msra.mxu1 %v913_v56 }
  0x62   :  { %671 = vmatprep.subr.bf16.mxu0 %v904_v57  ;;  %744 = vmatprep.subr.bf16.mxu1 %v906_v58 }
  0x64   :  { %576 = vmatmul.mubr.bf16.gmra.mxu0 %v968_v61  ;;  %649 = vmatmul.mubr.bf16.gmra.mxu1 %v968_v61 }
  0x65   :  { %672 = vmatpush1.bf16.msra.mxu0 %v903_v1  ;;  %745 = vmatpush1.bf16.msra.mxu1 %v905_v2 }
  0x66   :  { %673 = vmatprep.subr.bf16.mxu0 %v896_v3  ;;  %746 = vmatprep.subr.bf16.mxu1 %v898_v4 }
  0x67   :  { %691 = vmatprep.mubr.bf16.mxu0 %v1062_v0  ;;  %764 = vmatprep.mubr.bf16.mxu1 %v1062_v0 }
  0x69   :  { %674 = vmatpush1.bf16.msra.mxu0 %v895_v5  ;;  %747 = vmatpush1.bf16.msra.mxu1 %v897_v6  ;;  %v147_v5 = vsub.s32 4, %v1124_v8 }
  0x6c   :  { %692 = vmatmul.mubr.bf16.vlgmr.msra.gmra.mxu0 %v1098_v10  ;;  %765 = vmatmul.mubr.bf16.vlgmr.msra.gmra.mxu1 %v1098_v10  ;;  %v1127_v10 = vld [vmem:[#allocation7] sm:$0xff] }
  0x6d   :  { %701 = vmatprep.mubr.bf16.mxu0 %v1062_v0  ;;  %774 = vmatprep.mubr.bf16.mxu1 %v1062_v0  ;;  %v1133_v14 = vrot.slane %v1127_v10, %v131_v9  ;;  %v1139_v15 = vrot.slane %v1127_v10, %v135_v12  ;;  %v1142_v17 = vrot.slane %v1127_v10, %v143_v13  ;;  %v155_v9 = vsub.s32 6, %v1124_v8 }
  0x6e   :  { %v151_v13 = vsub.s32 5, %v1124_v8 }
  0x74   :  { %702 = vmatmul.mubr.bf16.gmra.mxu0 %v1104_v27  ;;  %775 = vmatmul.mubr.bf16.gmra.mxu1 %v1104_v27 }
  0x75   :  { %711 = vmatprep.mubr.bf16.mxu0 %v1062_v0  ;;  %784 = vmatprep.mubr.bf16.mxu1 %v1062_v0 }
  0x7c   :  { %712 = vmatmul.mubr.bf16.gmra.mxu0 %v967_v44  ;;  %785 = vmatmul.mubr.bf16.gmra.mxu1 %v967_v44 }
  0x7d   :  { %721 = vmatprep.mubr.bf16.mxu0 %v1062_v0  ;;  %794 = vmatprep.mubr.bf16.mxu1 %v1062_v0  ;;  %v1136_v0 = vrot.slane %v1127_v10, %v139_v11 }
  0x84   :  { %722 = vmatmul.mubr.bf16.gmra.mxu0 %v968_v61  ;;  %795 = vmatmul.mubr.bf16.gmra.mxu1 %v968_v61 }
 0x10c   :  { %v547_v16 = vpop.f32.mrf.mxu0  ;;  %v620_v19 = vpop.f32.mrf.mxu1 }
 0x10d   :  { %v548_v18 = vadd.f32 %v547_v16, %v1133_v14  ;;  %v621_v20 = vadd.f32 %v620_v19, %v1136_v0  ;;  %v159_v19 = vsub.s32 7, %v1124_v8  ;;  %v1186_v8 = vrot.slane %v1127_v10, %v151_v13 }
 0x10e   :  { %v549_v21 = vpop.f32.mrf.mxu0  ;;  %v622_v23 = vpop.f32.mrf.mxu1 }
 0x10f   :  { %805 = vst [vmem:[#allocation8] sm:$0xff] %v548_v18  ;;  %v550_v22 = vadd.f32 %v549_v21, %v1139_v15  ;;  %807 = vst [vmem:[#allocation8 + $0x10] sm:$0xff] %v621_v20  ;;  %v623_v24 = vadd.f32 %v622_v23, %v1142_v17 }
 0x110   :  { %v551_v25 = vpop.f32.mrf.mxu0  ;;  %v624_v27 = vpop.f32.mrf.mxu1 }
 0x111   :  { %806 = vst [vmem:[#allocation8 + $0x8] sm:$0xff] %v550_v22  ;;  %v552_v26 = vadd.f32 %v551_v25, %v1133_v14  ;;  %808 = vst [vmem:[#allocation8 + $0x18] sm:$0xff] %v623_v24  ;;  %v625_v28 = vadd.f32 %v624_v27, %v1136_v0  ;;  %v1178_v22 = vrot.slane %v1127_v10, %v147_v5 }
 0x112   :  { %v553_v29 = vpop.f32.mrf.mxu0  ;;  %v626_v31 = vpop.f32.mrf.mxu1  ;;  %v1182_v25 = vrot.slane %v1127_v10, %v155_v9 }
 0x113   :  { %813 = vst [vmem:[#allocation8 + $0x40] sm:$0xff] %v552_v26  ;;  %v554_v30 = vadd.f32 %v553_v29, %v1139_v15  ;;  %815 = vst [vmem:[#allocation8 + $0x50] sm:$0xff] %v625_v28  ;;  %v627_v32 = vadd.f32 %v626_v31, %v1142_v17  ;;  %v1190_v29 = vrot.slane %v1127_v10, %v159_v19 }
 0x114   :  { %v557_v33 = vpop.f32.mrf.mxu0  ;;  %v630_v35 = vpop.f32.mrf.mxu1 }
 0x115   :  { %814 = vst [vmem:[#allocation8 + $0x48] sm:$0xff] %v554_v30  ;;  %v558_v34 = vadd.f32 %v557_v33, %v1133_v14  ;;  %816 = vst [vmem:[#allocation8 + $0x58] sm:$0xff] %v627_v32  ;;  %v631_v36 = vadd.f32 %v630_v35, %v1136_v0 }
 0x116   :  { %v559_v37 = vpop.f32.mrf.mxu0  ;;  %v632_v39 = vpop.f32.mrf.mxu1 }
 0x117   :  { %821 = vst [vmem:[#allocation8 + $0x80] sm:$0xff] %v558_v34  ;;  %v560_v38 = vadd.f32 %v559_v37, %v1139_v15  ;;  %823 = vst [vmem:[#allocation8 + $0x90] sm:$0xff] %v631_v36  ;;  %v633_v40 = vadd.f32 %v632_v39, %v1142_v17 }
 0x118   :  { %v561_v41 = vpop.f32.mrf.mxu0  ;;  %v634_v43 = vpop.f32.mrf.mxu1 }
 0x119   :  { %822 = vst [vmem:[#allocation8 + $0x88] sm:$0xff] %v560_v38  ;;  %v562_v42 = vadd.f32 %v561_v41, %v1133_v14  ;;  %824 = vst [vmem:[#allocation8 + $0x98] sm:$0xff] %v633_v40  ;;  %v635_v44 = vadd.f32 %v634_v43, %v1136_v0 }
 0x11a   :  { %v563_v45 = vpop.f32.mrf.mxu0  ;;  %v636_v47 = vpop.f32.mrf.mxu1 }
 0x11b   :  { %829 = vst [vmem:[#allocation8 + $0xc0] sm:$0xff] %v562_v42  ;;  %v564_v46 = vadd.f32 %v563_v45, %v1139_v15  ;;  %831 = vst [vmem:[#allocation8 + $0xd0] sm:$0xff] %v635_v44  ;;  %v637_v48 = vadd.f32 %v636_v47, %v1142_v17 }
 0x11c   :  { %v567_v49 = vpop.f32.mrf.mxu0  ;;  %v640_v51 = vpop.f32.mrf.mxu1 }
 0x11d   :  { %830 = vst [vmem:[#allocation8 + $0xc8] sm:$0xff] %v564_v46  ;;  %v568_v50 = vadd.f32 %v567_v49, %v1133_v14  ;;  %832 = vst [vmem:[#allocation8 + $0xd8] sm:$0xff] %v637_v48  ;;  %v641_v52 = vadd.f32 %v640_v51, %v1136_v0 }
 0x11e   :  { %v569_v53 = vpop.f32.mrf.mxu0  ;;  %v642_v55 = vpop.f32.mrf.mxu1 }
 0x11f   :  { %837 = vst [vmem:[#allocation8 + $0x100] sm:$0xff] %v568_v50  ;;  %v570_v54 = vadd.f32 %v569_v53, %v1139_v15  ;;  %839 = vst [vmem:[#allocation8 + $0x110] sm:$0xff] %v641_v52  ;;  %v643_v56 = vadd.f32 %v642_v55, %v1142_v17 }
 0x120   :  { %v571_v57 = vpop.f32.mrf.mxu0  ;;  %v644_v59 = vpop.f32.mrf.mxu1 }
 0x121   :  { %838 = vst [vmem:[#allocation8 + $0x108] sm:$0xff] %v570_v54  ;;  %v572_v58 = vadd.f32 %v571_v57, %v1133_v14  ;;  %840 = vst [vmem:[#allocation8 + $0x118] sm:$0xff] %v643_v56  ;;  %v645_v60 = vadd.f32 %v644_v59, %v1136_v0 }
 0x122   :  { %v573_v61 = vpop.f32.mrf.mxu0  ;;  %v646_v63 = vpop.f32.mrf.mxu1 }
 0x123   :  { %845 = vst [vmem:[#allocation8 + $0x140] sm:$0xff] %v572_v58  ;;  %v574_v62 = vadd.f32 %v573_v61, %v1139_v15  ;;  %847 = vst [vmem:[#allocation8 + $0x150] sm:$0xff] %v645_v60  ;;  %v647_v1 = vadd.f32 %v646_v63, %v1142_v17 }
 0x124   :  { %v577_v2 = vpop.f32.mrf.mxu0  ;;  %v650_v4 = vpop.f32.mrf.mxu1 }
 0x125   :  { %846 = vst [vmem:[#allocation8 + $0x148] sm:$0xff] %v574_v62  ;;  %v578_v3 = vadd.f32 %v577_v2, %v1133_v14  ;;  %848 = vst [vmem:[#allocation8 + $0x158] sm:$0xff] %v647_v1  ;;  %v651_v6 = vadd.f32 %v650_v4, %v1136_v0 }
 0x126   :  { %v579_v7 = vpop.f32.mrf.mxu0  ;;  %v652_v12 = vpop.f32.mrf.mxu1 }
 0x127   :  { %853 = vst [vmem:[#allocation8 + $0x180] sm:$0xff] %v578_v3  ;;  %v580_v11 = vadd.f32 %v579_v7, %v1139_v15  ;;  %855 = vst [vmem:[#allocation8 + $0x190] sm:$0xff] %v651_v6  ;;  %v653_v16 = vadd.f32 %v652_v12, %v1142_v17 }
 0x128   :  { %v581_v18 = vpop.f32.mrf.mxu0  ;;  %v654_v21 = vpop.f32.mrf.mxu1 }
 0x129   :  { %854 = vst [vmem:[#allocation8 + $0x188] sm:$0xff] %v580_v11  ;;  %v582_v20 = vadd.f32 %v581_v18, %v1133_v14  ;;  %856 = vst [vmem:[#allocation8 + $0x198] sm:$0xff] %v653_v16  ;;  %v655_v23 = vadd.f32 %v654_v21, %v1136_v0 }
 0x12a   :  { %v583_v24 = vpop.f32.mrf.mxu0  ;;  %v656_v27 = vpop.f32.mrf.mxu1 }
 0x12b   :  { %861 = vst [vmem:[#allocation8 + $0x1c0] sm:$0xff] %v582_v20  ;;  %v584_v26 = vadd.f32 %v583_v24, %v1139_v15  ;;  %863 = vst [vmem:[#allocation8 + $0x1d0] sm:$0xff] %v655_v23  ;;  %v657_v14 = vadd.f32 %v656_v27, %v1142_v17 }
 0x12c   :  { %v693_v28 = vpop.f32.mrf.mxu0  ;;  %v766_v30 = vpop.f32.mrf.mxu1 }
 0x12d   :  { %862 = vst [vmem:[#allocation8 + $0x1c8] sm:$0xff] %v584_v26  ;;  %v694_v0 = vadd.f32 %v693_v28, %v1178_v22  ;;  %864 = vst [vmem:[#allocation8 + $0x1d8] sm:$0xff] %v657_v14  ;;  %v767_v31 = vadd.f32 %v766_v30, %v1182_v25 }
 0x12e   :  { %v695_v32 = vpop.f32.mrf.mxu0  ;;  %v768_v33 = vpop.f32.mrf.mxu1 }
 0x12f   :  { %809 = vst [vmem:[#allocation8 + $0x20] sm:$0xff] %v694_v0  ;;  %v696_v15 = vadd.f32 %v695_v32, %v1186_v8  ;;  %811 = vst [vmem:[#allocation8 + $0x30] sm:$0xff] %v767_v31  ;;  %v769_v34 = vadd.f32 %v768_v33, %v1190_v29 }
 0x130   :  { %v697_v17 = vpop.f32.mrf.mxu0  ;;  %v770_v35 = vpop.f32.mrf.mxu1 }
 0x131   :  { %810 = vst [vmem:[#allocation8 + $0x28] sm:$0xff] %v696_v15  ;;  %v698_v10 = vadd.f32 %v697_v17, %v1178_v22  ;;  %812 = vst [vmem:[#allocation8 + $0x38] sm:$0xff] %v769_v34  ;;  %v771_v36 = vadd.f32 %v770_v35, %v1182_v25 }
 0x132   :  { %v699_v37 = vpop.f32.mrf.mxu0  ;;  %v772_v39 = vpop.f32.mrf.mxu1 }
 0x133   :  { %817 = vst [vmem:[#allocation8 + $0x60] sm:$0xff] %v698_v10  ;;  %v700_v38 = vadd.f32 %v699_v37, %v1186_v8  ;;  %819 = vst [vmem:[#allocation8 + $0x70] sm:$0xff] %v771_v36  ;;  %v773_v40 = vadd.f32 %v772_v39, %v1190_v29 }
 0x134   :  { %v703_v41 = vpop.f32.mrf.mxu0  ;;  %v776_v43 = vpop.f32.mrf.mxu1 }
 0x135   :  { %818 = vst [vmem:[#allocation8 + $0x68] sm:$0xff] %v700_v38  ;;  %v704_v42 = vadd.f32 %v703_v41, %v1178_v22  ;;  %820 = vst [vmem:[#allocation8 + $0x78] sm:$0xff] %v773_v40  ;;  %v777_v44 = vadd.f32 %v776_v43, %v1182_v25 }
 0x136   :  { %v705_v45 = vpop.f32.mrf.mxu0  ;;  %v778_v47 = vpop.f32.mrf.mxu1 }
 0x137   :  { %825 = vst [vmem:[#allocation8 + $0xa0] sm:$0xff] %v704_v42  ;;  %v706_v46 = vadd.f32 %v705_v45, %v1186_v8  ;;  %827 = vst [vmem:[#allocation8 + $0xb0] sm:$0xff] %v777_v44  ;;  %v779_v48 = vadd.f32 %v778_v47, %v1190_v29 }
 0x138   :  { %v707_v49 = vpop.f32.mrf.mxu0  ;;  %v780_v51 = vpop.f32.mrf.mxu1 }
 0x139   :  { %826 = vst [vmem:[#allocation8 + $0xa8] sm:$0xff] %v706_v46  ;;  %v708_v50 = vadd.f32 %v707_v49, %v1178_v22  ;;  %828 = vst [vmem:[#allocation8 + $0xb8] sm:$0xff] %v779_v48  ;;  %v781_v52 = vadd.f32 %v780_v51, %v1182_v25 }
 0x13a   :  { %v709_v53 = vpop.f32.mrf.mxu0  ;;  %v782_v55 = vpop.f32.mrf.mxu1 }
 0x13b   :  { %833 = vst [vmem:[#allocation8 + $0xe0] sm:$0xff] %v708_v50  ;;  %v710_v54 = vadd.f32 %v709_v53, %v1186_v8  ;;  %835 = vst [vmem:[#allocation8 + $0xf0] sm:$0xff] %v781_v52  ;;  %v783_v56 = vadd.f32 %v782_v55, %v1190_v29 }
 0x13c   :  { %v713_v57 = vpop.f32.mrf.mxu0  ;;  %v786_v59 = vpop.f32.mrf.mxu1 }
 0x13d   :  { %834 = vst [vmem:[#allocation8 + $0xe8] sm:$0xff] %v710_v54  ;;  %v714_v58 = vadd.f32 %v713_v57, %v1178_v22  ;;  %836 = vst [vmem:[#allocation8 + $0xf8] sm:$0xff] %v783_v56  ;;  %v787_v60 = vadd.f32 %v786_v59, %v1182_v25 }
 0x13e   :  { %v715_v61 = vpop.f32.mrf.mxu0  ;;  %v788_v63 = vpop.f32.mrf.mxu1 }
 0x13f   :  { %841 = vst [vmem:[#allocation8 + $0x120] sm:$0xff] %v714_v58  ;;  %v716_v62 = vadd.f32 %v715_v61, %v1186_v8  ;;  %843 = vst [vmem:[#allocation8 + $0x130] sm:$0xff] %v787_v60  ;;  %v789_v1 = vadd.f32 %v788_v63, %v1190_v29 }
 0x140   :  { %v717_v2 = vpop.f32.mrf.mxu0  ;;  %v790_v4 = vpop.f32.mrf.mxu1 }
 0x141   :  { %842 = vst [vmem:[#allocation8 + $0x128] sm:$0xff] %v716_v62  ;;  %v718_v3 = vadd.f32 %v717_v2, %v1178_v22  ;;  %844 = vst [vmem:[#allocation8 + $0x138] sm:$0xff] %v789_v1  ;;  %v791_v5 = vadd.f32 %v790_v4, %v1182_v25 }
 0x142   :  { %v719_v6 = vpop.f32.mrf.mxu0  ;;  %v792_v9 = vpop.f32.mrf.mxu1 }
 0x143   :  { %849 = vst [vmem:[#allocation8 + $0x160] sm:$0xff] %v718_v3  ;;  %v720_v7 = vadd.f32 %v719_v6, %v1186_v8  ;;  %851 = vst [vmem:[#allocation8 + $0x170] sm:$0xff] %v791_v5  ;;  %v793_v11 = vadd.f32 %v792_v9, %v1190_v29 }
 0x144   :  { %v723_v12 = vpop.f32.mrf.mxu0  ;;  %v796_v16 = vpop.f32.mrf.mxu1 }
 0x145   :  { %850 = vst [vmem:[#allocation8 + $0x168] sm:$0xff] %v720_v7  ;;  %v724_v13 = vadd.f32 %v723_v12, %v1178_v22  ;;  %852 = vst [vmem:[#allocation8 + $0x178] sm:$0xff] %v793_v11  ;;  %v797_v18 = vadd.f32 %v796_v16, %v1182_v25 }
 0x146   :  { %v725_v19 = vpop.f32.mrf.mxu0  ;;  %v798_v21 = vpop.f32.mrf.mxu1 }
 0x147   :  { %857 = vst [vmem:[#allocation8 + $0x1a0] sm:$0xff] %v724_v13  ;;  %v726_v20 = vadd.f32 %v725_v19, %v1186_v8  ;;  %859 = vst [vmem:[#allocation8 + $0x1b0] sm:$0xff] %v797_v18  ;;  %v799_v23 = vadd.f32 %v798_v21, %v1190_v29 }
 0x148   :  { %v727_v24 = vpop.f32.mrf.mxu0  ;;  %v800_v27 = vpop.f32.mrf.mxu1 }
 0x149   :  { %858 = vst [vmem:[#allocation8 + $0x1a8] sm:$0xff] %v726_v20  ;;  %v728_v26 = vadd.f32 %v727_v24, %v1178_v22  ;;  %860 = vst [vmem:[#allocation8 + $0x1b8] sm:$0xff] %v799_v23  ;;  %v801_v14 = vadd.f32 %v800_v27, %v1182_v25 }
 0x14a   :  { %v729_v28 = vpop.f32.mrf.mxu0  ;;  %v802_v30 = vpop.f32.mrf.mxu1 }
 0x14b   :  { %865 = vst [vmem:[#allocation8 + $0x1e0] sm:$0xff] %v728_v26  ;;  %v730_v0 = vadd.f32 %v729_v28, %v1186_v8  ;;  %867 = vst [vmem:[#allocation8 + $0x1f0] sm:$0xff] %v801_v14  ;;  %v803_v31 = vadd.f32 %v802_v30, %v1190_v29 }
 0x14d   :  { %866 = vst [vmem:[#allocation8 + $0x1e8] sm:$0xff] %v730_v0  ;;  %868 = vst [vmem:[#allocation8 + $0x1f8] sm:$0xff] %v803_v31 }
 0x14e   :  { %1040 = shalt.err (!%p1037_p5)
}
 0x14f   :  { %s1064_s4 = smov 1024  }
 0x150   :  { %880 = dma.vmem_to_hbm [thread:$0]  %s875_s2, 8192, %s1231_s3, [#allocation4], %s1064_s4, %s1064_s4, %s1059_s22  }
 0x151   :  { %1053 = dma.done.wait [#allocation4], 8192  }
 0x152   :  { %1054 = vsyncadd [#allocation4], 4294959104 }
 0x153   :  { %884 = vsyncpa [#allocation3], 1 }
 0x154   :  { %885 = vsyncpa [#allocation6], 1 }
 0x155   :  { %886 = vsyncpa [#allocation4], 1 }

</bundles_post_ra>
